<compile_context>
chip_gen: v6e
topology: v6e:2x2x1
jax: 0.10.0
libtpu: 0.0.40
codegen_flags: <defaults>
</compile_context>

<pallas_src>
import functools

import jax
import jax.numpy as jnp
from jax.experimental import pallas as pl
from jax.experimental.pallas import tpu as pltpu

LANES = 128  # lane-dense width for all padded weights, activations and the output


# ---------------------------------------------------------------------------
# Parameter packing: one contiguous (total_rows, 128) f32 blob.
#   For each layer l (policy+baseline head fused into one final layer):
#     rows [off : off+in_rows]   = W_l padded to (in_rows, 128) with zeros
#     row  [off+in_rows]         = b_l padded to (1, 128)
#     block padded to a multiple of 8 rows (sublane-aligned offsets).
#   in_rows = obs_dim for the first layer, 128 for all later layers (matches the
#   padded activation width, so no lane slicing is ever needed in the kernel).
# ---------------------------------------------------------------------------
def pack_params(hidden_params, pi_params, v_params, obs_dim):
    w_pi, b_pi = pi_params
    w_v, b_v = v_params
    w_head = jnp.concatenate([w_pi, w_v], axis=1)   # (h_last, act_dim + 1)
    b_head = jnp.concatenate([b_pi, b_v], axis=1)   # (1, act_dim + 1)
    layers = list(hidden_params) + [(w_head, b_head)]

    blocks = []
    layout = []          # (row_offset, in_rows) per layer, all static
    off = 0
    prev_width = int(obs_dim)
    for w, b in layers:
        in_actual, out_actual = int(w.shape[0]), int(w.shape[1])
        in_rows = prev_width
        w_pad = jnp.zeros((in_rows, LANES), jnp.float32)
        w_pad = w_pad.at[:in_actual, :out_actual].set(w.astype(jnp.float32))
        b_pad = jnp.zeros((1, LANES), jnp.float32)
        b_pad = b_pad.at[:, :out_actual].set(b.astype(jnp.float32))
        blk = jnp.concatenate([w_pad, b_pad], axis=0)      # (in_rows + 1, 128)
        rows_pad = (-blk.shape[0]) % 8
        if rows_pad:
            blk = jnp.pad(blk, ((0, rows_pad), (0, 0)))
        blocks.append(blk)
        layout.append((off, in_rows))
        off += blk.shape[0]
        prev_width = LANES
    blob = jnp.concatenate(blocks, axis=0)                  # (total_rows, 128)
    return blob, tuple(layout)


def _make_policy_kernel(layout, act_dim):
    """Full MLP kernel; every matmul runs at the padded 128-lane width."""
    n_layers = len(layout)

    def kernel(obs_ref, params_ref, out_ref):
        h = obs_ref[...]
        for li, (off, in_rows) in enumerate(layout):
            w = params_ref[off:off + in_rows, :]                 # sublane-aligned view
            b = params_ref[off + in_rows:off + in_rows + 1, :]   # (1, 128) bias row
            z = jnp.dot(h, w, preferred_element_type=jnp.float32) + b
            if li < n_layers - 1:
                h = jnp.maximum(z, 0.0)
            else:
                # Fused head: cols [0:act_dim] = policy logits, col act_dim = baseline,
                # cols beyond are zero-padded. Mask the non-policy columns for softmax.
                col = jax.lax.broadcasted_iota(jnp.int32, z.shape, 1)
                pol_mask = col < act_dim
                logits = jnp.where(pol_mask, z, -1e30)
                m = jnp.max(logits, axis=-1, keepdims=True)
                e = jnp.exp(logits - m)                          # masked cols underflow to 0
                denom = jnp.sum(e, axis=-1, keepdims=True)
                r = pl.reciprocal(denom, approx=True)            # EUP slot
                r = r * (2.0 - denom * r)                        # 1 Newton step -> ~f32 exact
                probs = e * r
                # Lane-dense store: probs in policy cols, raw z (baseline / zeros) elsewhere.
                out_ref[...] = jnp.where(pol_mask, probs, z).astype(out_ref.dtype)

    return kernel


def init_policy_params(key, obs_dim, act_dim, hidden_sizes):
    """Deterministic init mirroring nn.Linear shapes.

    Weights stored as (in_dim, out_dim) (transposed vs. PyTorch); biases as (1, out_dim).
    """
    sizes = [obs_dim] + list(hidden_sizes)
    params = []
    for i in range(len(sizes) - 1):
        key, kw, kb = jax.random.split(key, 3)
        bound = 1.0 / jnp.sqrt(sizes[i])
        w = jax.random.uniform(kw, (sizes[i], sizes[i + 1]), jnp.float32, -bound, bound)
        b = jax.random.uniform(kb, (1, sizes[i + 1]), jnp.float32, -bound, bound)
        params.append((w, b))
    fan_in = hidden_sizes[-1]
    bound = 1.0 / jnp.sqrt(fan_in)
    key, kw, kb = jax.random.split(key, 3)
    w_pi = jax.random.uniform(kw, (fan_in, act_dim), jnp.float32, -bound, bound)
    b_pi = jax.random.uniform(kb, (1, act_dim), jnp.float32, -bound, bound)
    key, kw, kb = jax.random.split(key, 3)
    w_v = jax.random.uniform(kw, (fan_in, 1), jnp.float32, -bound, bound)
    b_v = jax.random.uniform(kb, (1, 1), jnp.float32, -bound, bound)
    return params, (w_pi, b_pi), (w_v, b_v)


def _pick_block_b(B, target=4096):
    """Large batch tile (multiple of 8) for a cdiv grid; >=2 steps for big batches."""
    bb = max(8, ((min(B, target) + 7) // 8) * 8)
    # v7x megacore: give dimension_semantics=("parallel",) at least 2 steps to shard
    # when the batch is large enough that splitting is worthwhile.
    if pl.cdiv(B, bb) < 2 and B >= 2048:
        bb = max(8, (((B + 1) // 2 + 7) // 8) * 8)
    return bb


@functools.partial(jax.jit, static_argnames=("layout", "act_dim"))
def policy_net_forward(obs, param_blob, *, layout, act_dim):
    """Forward pass matching PolicyNet.forward: returns (probs, baseline).

    probs:    (B, act_dim)   (torch.squeeze(probs, -1) is a no-op for act_dim > 1)
    baseline: (B,)
    """
    B, obs_dim = obs.shape
    total_rows, lanes = param_blob.shape
    block_b = _pick_block_b(B)
    grid = (pl.cdiv(B, block_b),)

    kernel = _make_policy_kernel(layout, act_dim)

    flops = 2 * B * sum(in_rows * lanes for _, in_rows in layout)
    bytes_accessed = 4 * (B * obs_dim + total_rows * lanes + B * lanes)
    cost = pl.CostEstimate(
        flops=flops,
        transcendentals=B * (lanes + 1),
        bytes_accessed=bytes_accessed,
    )

    out = pl.pallas_call(
        kernel,
        out_shape=jax.ShapeDtypeStruct((B, lanes), jnp.float32),
        grid=grid,
        in_specs=[
            pl.BlockSpec((block_b, obs_dim), lambda i: (i, 0)),
            pl.BlockSpec((total_rows, lanes), lambda i: (0, 0)),  # resident weight blob
        ],
        out_specs=pl.BlockSpec((block_b, lanes), lambda i: (i, 0)),  # lane-dense output
        compiler_params=pltpu.CompilerParams(
            dimension_semantics=("parallel",),  # shards batch tiles across v7x's 2 TCs
        ),
        cost_estimate=cost,
    )(obs, param_blob)

    probs = out[:, :act_dim]
    baseline = out[:, act_dim]
    return probs, baseline


def _reference_forward(obs, hidden_params, pi_params, v_params):
    """Pure-JAX reference mirroring the PyTorch module."""
    x = obs
    for w, b in hidden_params:
        x = jax.nn.relu(x @ w + b)
    probs = jax.nn.softmax(x @ pi_params[0] + pi_params[1], axis=-1)
    baseline = x @ v_params[0] + v_params[1]
    return probs, jnp.squeeze(baseline, -1)


if __name__ == "__main__":
    batch = 8
    obs_dim = 16
    act_dim = 4
    hidden_sizes = [32, 32]

    key = jax.random.PRNGKey(0)
    key, k_obs = jax.random.split(key)
    obs = jax.random.normal(k_obs, (batch, obs_dim), dtype=jnp.float32)

    hidden_params, pi_params, v_params = init_policy_params(
        key, obs_dim, act_dim, hidden_sizes
    )

    # Pack once (amortized across RL steps); the blob is reused every call.
    param_blob, layout = pack_params(hidden_params, pi_params, v_params, obs_dim)
    param_blob = jax.block_until_ready(param_blob)

    probs, baseline = policy_net_forward(obs, param_blob, layout=layout, act_dim=act_dim)
    probs = jax.block_until_ready(probs)
    baseline = jax.block_until_ready(baseline)

    # Sanity check against the pure-JAX reference.
    ref_probs, ref_baseline = _reference_forward(obs, hidden_params, pi_params, v_params)
    assert probs.shape == (batch, act_dim)
    assert baseline.shape == (batch,)
    assert jnp.allclose(probs, ref_probs, atol=1e-5, rtol=1e-5)
    assert jnp.allclose(baseline, ref_baseline, atol=1e-5, rtol=1e-5)
    assert jnp.allclose(jnp.sum(probs, axis=-1), 1.0, atol=1e-5)

    print("KERNEL_OK")
</pallas_src>

<mosaic_0001>
module attributes {stable_mosaic.version = 11 : i64} {
  func.func @kernel(%arg0: i32, %arg1: memref<8x16xf32, #tpu.memory_space<vmem>>, %arg2: memref<296x128xf32, #tpu.memory_space<vmem>>, %arg3: memref<8x128xf32, #tpu.memory_space<vmem>>) attributes {dimension_semantics = [#tpu.dimension_semantics<parallel>], iteration_bounds = array<i64: 1>, scalar_prefetch = 0 : i64, scratch_operands = 0 : i64, tpu.core_type = #tpu.core_type<tc>, window_params = [{transform_indices = @transform_0, window_bounds = array<i64: 8, 16>}, {pipeline_mode = #tpu.pipeline_mode<synchronous>, transform_indices = @transform_1, window_bounds = array<i64: 296, 128>}, {transform_indices = @transform_2, window_bounds = array<i64: 8, 128>}]} {
    %c0 = arith.constant 0 : index
    %c0_0 = arith.constant 0 : index
    %0 = vector.load %arg1[%c0, %c0_0] : memref<8x16xf32, #tpu.memory_space<vmem>>, vector<8x16xf32>
    %c0_1 = arith.constant 0 : index
    %c0_2 = arith.constant 0 : index
    %1 = vector.load %arg2[%c0_1, %c0_2] : memref<296x128xf32, #tpu.memory_space<vmem>>, vector<16x128xf32>
    %c16 = arith.constant 16 : index
    %c0_3 = arith.constant 0 : index
    %2 = vector.load %arg2[%c16, %c0_3] : memref<296x128xf32, #tpu.memory_space<vmem>>, vector<1x128xf32>
    %cst = arith.constant dense<0.000000e+00> : vector<8x128xf32>
    %3 = tpu.matmul %0, %1, %cst {dimension_numbers = #tpu.dot_dimension_numbers<[1], [0], [0], [1], [0, 0, 1, 1], [], []>} : vector<8x16xf32>, vector<16x128xf32>, vector<8x128xf32> -> vector<8x128xf32>
    %4 = vector.broadcast %2 : vector<1x128xf32> to vector<8x128xf32>
    %5 = arith.addf %3, %4 : vector<8x128xf32>
    %cst_4 = arith.constant 0.000000e+00 : f32
    %6 = vector.broadcast %cst_4 : f32 to vector<8x128xf32>
    %7 = arith.maximumf %5, %6 : vector<8x128xf32>
    %c24 = arith.constant 24 : index
    %c0_5 = arith.constant 0 : index
    %8 = vector.load %arg2[%c24, %c0_5] : memref<296x128xf32, #tpu.memory_space<vmem>>, vector<128x128xf32>
    %c152 = arith.constant 152 : index
    %c0_6 = arith.constant 0 : index
    %9 = vector.load %arg2[%c152, %c0_6] : memref<296x128xf32, #tpu.memory_space<vmem>>, vector<1x128xf32>
    %cst_7 = arith.constant dense<0.000000e+00> : vector<8x128xf32>
    %10 = tpu.matmul %7, %8, %cst_7 {dimension_numbers = #tpu.dot_dimension_numbers<[1], [0], [0], [1], [0, 0, 1, 1], [], []>} : vector<8x128xf32>, vector<128x128xf32>, vector<8x128xf32> -> vector<8x128xf32>
    %11 = vector.broadcast %9 : vector<1x128xf32> to vector<8x128xf32>
    %12 = arith.addf %10, %11 : vector<8x128xf32>
    %cst_8 = arith.constant 0.000000e+00 : f32
    %13 = vector.broadcast %cst_8 : f32 to vector<8x128xf32>
    %14 = arith.maximumf %12, %13 : vector<8x128xf32>
    %c160 = arith.constant 160 : index
    %c0_9 = arith.constant 0 : index
    %15 = vector.load %arg2[%c160, %c0_9] : memref<296x128xf32, #tpu.memory_space<vmem>>, vector<128x128xf32>
    %c288 = arith.constant 288 : index
    %c0_10 = arith.constant 0 : index
    %16 = vector.load %arg2[%c288, %c0_10] : memref<296x128xf32, #tpu.memory_space<vmem>>, vector<1x128xf32>
    %cst_11 = arith.constant dense<0.000000e+00> : vector<8x128xf32>
    %17 = tpu.matmul %14, %15, %cst_11 {dimension_numbers = #tpu.dot_dimension_numbers<[1], [0], [0], [1], [0, 0, 1, 1], [], []>} : vector<8x128xf32>, vector<128x128xf32>, vector<8x128xf32> -> vector<8x128xf32>
    %18 = vector.broadcast %16 : vector<1x128xf32> to vector<8x128xf32>
    %19 = arith.addf %17, %18 : vector<8x128xf32>
    %20 = tpu.iota {dimensions = array<i32: 1>} : vector<8x128xi32>
    %c4_i32 = arith.constant 4 : i32
    %21 = vector.broadcast %c4_i32 : i32 to vector<8x128xi32>
    %22 = arith.cmpi slt, %20, %21 : vector<8x128xi32>
    %cst_12 = arith.constant -1.000000e+30 : f32
    %23 = vector.broadcast %cst_12 : f32 to vector<8x128xf32>
    %24 = arith.select %22, %19, %23 : vector<8x128xi1>, vector<8x128xf32>
    %cst_13 = arith.constant dense<0xFF800000> : vector<8xf32>
    %25 = vector.multi_reduction <maximumf>, %24, %cst_13 [1] : vector<8x128xf32> to vector<8xf32>
    %26 = vector.shape_cast %25 : vector<8xf32> to vector<8x1xf32>
    %27 = vector.broadcast %26 : vector<8x1xf32> to vector<8x128xf32>
    %28 = arith.subf %24, %27 : vector<8x128xf32>
    %29 = math.exp %28 : vector<8x128xf32>
    %cst_14 = arith.constant dense<0.000000e+00> : vector<8xf32>
    %30 = vector.multi_reduction <add>, %29, %cst_14 [1] : vector<8x128xf32> to vector<8xf32>
    %31 = vector.shape_cast %30 : vector<8xf32> to vector<8x1xf32>
    %32 = tpu.reciprocal %31 {approx = true} : vector<8x1xf32> -> vector<8x1xf32>
    %33 = arith.mulf %31, %32 : vector<8x1xf32>
    %cst_15 = arith.constant 2.000000e+00 : f32
    %34 = vector.broadcast %cst_15 : f32 to vector<8x1xf32>
    %35 = arith.subf %34, %33 : vector<8x1xf32>
    %36 = arith.mulf %32, %35 : vector<8x1xf32>
    %37 = vector.broadcast %36 : vector<8x1xf32> to vector<8x128xf32>
    %38 = arith.mulf %29, %37 : vector<8x128xf32>
    %39 = arith.select %22, %38, %19 : vector<8x128xi1>, vector<8x128xf32>
    %c0_16 = arith.constant 0 : index
    %c0_17 = arith.constant 0 : index
    %40 = vector.load %arg3[%c0_16, %c0_17] : memref<8x128xf32, #tpu.memory_space<vmem>>, vector<8x128xf32>
    tpu.vector_store %arg3[%c0_16, %c0_17], %39 {strides = array<i32>} : memref<8x128xf32, #tpu.memory_space<vmem>>, vector<8x128xf32>,
    return
  }
  func.func @transform_0(%arg0: i32) -> (i32, i32) {
    %c0_i32 = arith.constant 0 : i32
    %c0_i32_0 = arith.constant 0 : i32
    return %arg0, %c0_i32 : i32, i32
  }
  func.func @transform_1(%arg0: i32) -> (i32, i32) {
    %c0_i32 = arith.constant 0 : i32
    %c0_i32_0 = arith.constant 0 : i32
    %c0_i32_1 = arith.constant 0 : i32
    return %c0_i32, %c0_i32_0 : i32, i32
  }
  func.func @transform_2(%arg0: i32) -> (i32, i32) {
    %c0_i32 = arith.constant 0 : i32
    %c0_i32_0 = arith.constant 0 : i32
    return %arg0, %c0_i32 : i32, i32
  }
}

</mosaic_0001>

<bundles_post_ra>
// kernel: policy_net_forward.1
= control target key start
LH: loop header
LB: loop body
LE: loop exit
PB: predicated region body
PF: predicated region fallthrough
CT: control target
= control target key end

     0   :  { %7 = vsyncpa [#allocation3], 0  ;;  %s571_s0 = inlined_call_operand.hbm [shape: f32[8,16], index: 0, kind: input, shape index: {}]   ;;  %s572_s1 = inlined_call_operand.hbm [shape: f32[296,128], index: 1, kind: input, shape index: {}]   ;;  %s573_s2 = inlined_call_operand.vmem [shape: f32[8,128], index: 2, kind: output, shape index: {}]  }
   0x1   :  { %8 = vsyncpa [#allocation5], 0  ;;  %s499_s9 = smov [#allocation2]   ;;  %s500_s11 = smov [#allocation4]  }
   0x2   :  { %s15_s10 = sshll.u32 %s499_s9, 4  ;;  %s24_s12 = sshll.u32 %s500_s11, 4  ;;  %s16_s10 = int_to_ptr.vmem [resolvable:$true] %s15_s10  ;;  %s25_s12 = int_to_ptr.vmem [resolvable:$true] %s24_s12 }
   0x3   :  { %s463_s13 = scalar_lea.vmem %s16_s10, 128  ;;  %p468_p1 = scmp.lt.s32.totalorder %s16_s10, %s16_s10 }
   0x4   :  { %p464_p0 = scmp.ne.s32.totalorder %s16_s10, %s463_s13  ;;  %p469_p2 = scmp.lt.s32.totalorder %s463_s13, %s463_s13 }
   0x6   :  { %p470_p3 = por %p469_p2, %p468_p1 }
   0x8   :  { %p471_p4 = pnand %p470_p3, %p464_p0 }
   0xa   :  { %474 = shalt.err (!%p471_p4)
}
   0xb   :  { %18 = dma.hbm_to_vmem [thread:$0]  %s571_s0, 128, %s16_s10, [#allocation3]  }
   0xc   :  { %s483_s16 = scalar_lea.vmem %s25_s12, 4736  ;;  %p488_p6 = scmp.lt.s32.totalorder %s25_s12, %s25_s12 }
   0xd   :  { %p484_p5 = scmp.ne.s32.totalorder %s25_s12, %s483_s16  ;;  %p489_p7 = scmp.lt.s32.totalorder %s483_s16, %s483_s16 }
   0xf   :  { %p490_p8 = por %p489_p7, %p488_p6 }
  0x11   :  { %p491_p9 = pnand %p490_p8, %p484_p5 }
  0x13   :  { %494 = shalt.err (!%p491_p9)
}
  0x14   :  { %s501_s17 = smov 128   ;;  %s502_s18 = smov 8  }
  0x15   :  { %30 = dma.hbm_to_vmem [thread:$0]  %s572_s1, 4736, %s25_s12, [#allocation5], %s501_s17, %s501_s17, %s502_s18  }
  0x16   :  { %495 = dma.done.wait [#allocation3], 128  }
  0x17   :  { %496 = vsyncadd [#allocation3], 4294967168 }
  0x18   :  { %497 = dma.done.wait [#allocation5], 4736  }
  0x19   :  { %498 = vsyncadd [#allocation5], 4294962560  ;;  %v503_v0 = vmov 0.0   ;;  %vm504_vm0 = vmmov 0   ;;  %v39_v1 = vld [vmem:[#allocation4 + $0x8] sm:$0xff]  ;;  %v38_v2 = vld [vmem:[#allocation4] sm:$0xff]  ;;  %v303_v46 = vlaneseq }
  0x1a   :  { %368 = vmatprep.subr.mxu0 %v503_v0  ;;  %372 = vmatprep.mubr.msk.f32.mxu0 %vm504_vm0, %v503_v0  ;;  %v37_v3 = vld [vmem:[#allocation2] sm:$0xff]  ;;  %vm45_vm1 = vcmask 130048   ;;  %v135_v4 = vld [vmem:[#allocation4 + $0x90] sm:$0xff]  ;;  %v134_v5 = vld [vmem:[#allocation4 + $0x88] sm:$0xff] }
  0x1b   :  { %375 = vmatprep.subr.mxu1 %v503_v0  ;;  %407 = vmatprep.mubr.msk.f32.mxu1 %vm504_vm0, %v503_v0  ;;  %v133_v6 = vld [vmem:[#allocation4 + $0x80] sm:$0xff]  ;;  %v132_v7 = vld [vmem:[#allocation4 + $0x78] sm:$0xff]  ;;  %v131_v8 = vld [vmem:[#allocation4 + $0x70] sm:$0xff]  ;;  %v304_v47 = vand.u32 127, %v303_v46 }
  0x1c   :  { %369 = vmatpush3.msra.mxu0 %v39_v1  ;;  %376 = vmatpush3.msra.mxu1 %v135_v4  ;;  %v130_v9 = vld [vmem:[#allocation4 + $0x68] sm:$0xff]  ;;  %v129_v10 = vld [vmem:[#allocation4 + $0x60] sm:$0xff]  ;;  %v128_v11 = vld [vmem:[#allocation4 + $0x58] sm:$0xff] }
  0x1d   :  { %370 = vmatprep.subr.mxu0 %v503_v0  ;;  %377 = vmatprep.subr.mxu1 %v503_v0  ;;  %v127_v12 = vld [vmem:[#allocation4 + $0x50] sm:$0xff]  ;;  %v126_v13 = vld [vmem:[#allocation4 + $0x48] sm:$0xff]  ;;  %v125_v14 = vld [vmem:[#allocation4 + $0x40] sm:$0xff]  ;;  %vm305_vm2 = vcmp.lt.s32.totalorder %v304_v47, 4 }
  0x1e   :  { %371 = vmatpush3.msra.mxu0 %v38_v2  ;;  %378 = vmatpush3.msra.mxu1 %v134_v5  ;;  %v124_v15 = vld [vmem:[#allocation4 + $0x38] sm:$0xff]  ;;  %v123_v16 = vld [vmem:[#allocation4 + $0x30] sm:$0xff]  ;;  %v122_v17 = vld [vmem:[#allocation4 + $0x28] sm:$0xff] }
  0x1f   :  { %373 = vmatmul.mubr.msk.f32.vlgmr.msra.gmra.mxu0 %vm45_vm1, %v37_v3  ;;  %379 = vmatprep.subr.mxu1 %v503_v0  ;;  %v121_v18 = vld [vmem:[#allocation4 + $0x20] sm:$0xff]  ;;  %v120_v19 = vld [vmem:[#allocation4 + $0x18] sm:$0xff]  ;;  %v226_v21 = vld [vmem:[#allocation4 + $0x110] sm:$0xff] }
  0x20   :  { %410 = vmatprep.subr.mxu0 %v503_v0  ;;  %380 = vmatpush3.msra.mxu1 %v133_v6  ;;  %v227_v20 = vld [vmem:[#allocation4 + $0x118] sm:$0xff]  ;;  %v225_v22 = vld [vmem:[#allocation4 + $0x108] sm:$0xff]  ;;  %v224_v23 = vld [vmem:[#allocation4 + $0x100] sm:$0xff] }
  0x21   :  { %442 = vmatprep.mubr.msk.f32.mxu0 %vm504_vm0, %v503_v0  ;;  %381 = vmatprep.subr.mxu1 %v503_v0  ;;  %v223_v24 = vld [vmem:[#allocation4 + $0xf8] sm:$0xff]  ;;  %v222_v25 = vld [vmem:[#allocation4 + $0xf0] sm:$0xff]  ;;  %v221_v26 = vld [vmem:[#allocation4 + $0xe8] sm:$0xff] }
  0x22   :  { %382 = vmatpush3.msra.mxu1 %v132_v7  ;;  %411 = vmatpush3.msra.mxu0 %v227_v20  ;;  %v220_v27 = vld [vmem:[#allocation4 + $0xe0] sm:$0xff]  ;;  %v219_v28 = vld [vmem:[#allocation4 + $0xd8] sm:$0xff]  ;;  %v218_v29 = vld [vmem:[#allocation4 + $0xd0] sm:$0xff] }
  0x23   :  { %383 = vmatprep.subr.mxu1 %v503_v0  ;;  %412 = vmatprep.subr.mxu0 %v503_v0  ;;  %v217_v30 = vld [vmem:[#allocation4 + $0xc8] sm:$0xff]  ;;  %v216_v31 = vld [vmem:[#allocation4 + $0xc0] sm:$0xff]  ;;  %v215_v32 = vld [vmem:[#allocation4 + $0xb8] sm:$0xff] }
  0x24   :  { %384 = vmatpush3.msra.mxu1 %v131_v8  ;;  %413 = vmatpush3.msra.mxu0 %v226_v21  ;;  %v327_v33 = vld [vmem:[#allocation4 + $0x10] ss:$0 sm:$0xff]  ;;  %v213_v39 = vld [vmem:[#allocation4 + $0xa8] sm:$0xff]  ;;  %v212_v40 = vld [vmem:[#allocation4 + $0xa0] sm:$0xff] }
  0x25   :  { %385 = vmatprep.subr.mxu1 %v503_v0  ;;  %414 = vmatprep.subr.mxu0 %v503_v0  ;;  %v214_v38 = vld [vmem:[#allocation4 + $0xb0] sm:$0xff]  ;;  %v329_v41 = vld [vmem:[#allocation4 + $0x98] ss:$0 sm:$0xff]  ;;  %v330_v48 = vld [vmem:[#allocation4 + $0x120] ss:$0 sm:$0xff] }
  0x26   :  { %386 = vmatpush3.msra.mxu1 %v130_v9  ;;  %415 = vmatpush3.msra.mxu0 %v225_v22 }
  0x27   :  { %387 = vmatprep.subr.mxu1 %v503_v0  ;;  %416 = vmatprep.subr.mxu0 %v503_v0 }
  0x28   :  { %388 = vmatpush3.msra.mxu1 %v129_v10  ;;  %417 = vmatpush3.msra.mxu0 %v224_v23 }
  0x29   :  { %389 = vmatprep.subr.mxu1 %v503_v0  ;;  %418 = vmatprep.subr.mxu0 %v503_v0 }
  0x2a   :  { %390 = vmatpush3.msra.mxu1 %v128_v11  ;;  %419 = vmatpush3.msra.mxu0 %v223_v24 }
  0x2b   :  { %391 = vmatprep.subr.mxu1 %v503_v0  ;;  %420 = vmatprep.subr.mxu0 %v503_v0 }
  0x2c   :  { %392 = vmatpush3.msra.mxu1 %v127_v12  ;;  %421 = vmatpush3.msra.mxu0 %v222_v25 }
  0x2d   :  { %393 = vmatprep.subr.mxu1 %v503_v0  ;;  %422 = vmatprep.subr.mxu0 %v503_v0 }
  0x2e   :  { %394 = vmatpush3.msra.mxu1 %v126_v13  ;;  %423 = vmatpush3.msra.mxu0 %v221_v26 }
  0x2f   :  { %395 = vmatprep.subr.mxu1 %v503_v0  ;;  %424 = vmatprep.subr.mxu0 %v503_v0 }
  0x30   :  { %396 = vmatpush3.msra.mxu1 %v125_v14  ;;  %425 = vmatpush3.msra.mxu0 %v220_v27 }
  0x31   :  { %397 = vmatprep.subr.mxu1 %v503_v0  ;;  %426 = vmatprep.subr.mxu0 %v503_v0 }
  0x32   :  { %398 = vmatpush3.msra.mxu1 %v124_v15  ;;  %427 = vmatpush3.msra.mxu0 %v219_v28 }
  0x33   :  { %399 = vmatprep.subr.mxu1 %v503_v0  ;;  %428 = vmatprep.subr.mxu0 %v503_v0 }
  0x34   :  { %400 = vmatpush3.msra.mxu1 %v123_v16  ;;  %429 = vmatpush3.msra.mxu0 %v218_v29 }
  0x35   :  { %401 = vmatprep.subr.mxu1 %v503_v0  ;;  %430 = vmatprep.subr.mxu0 %v503_v0 }
  0x36   :  { %402 = vmatpush3.msra.mxu1 %v122_v17  ;;  %431 = vmatpush3.msra.mxu0 %v217_v30 }
  0x37   :  { %403 = vmatprep.subr.mxu1 %v503_v0  ;;  %432 = vmatprep.subr.mxu0 %v503_v0 }
  0x38   :  { %404 = vmatpush3.msra.mxu1 %v121_v18  ;;  %433 = vmatpush3.msra.mxu0 %v216_v31 }
  0x39   :  { %405 = vmatprep.subr.mxu1 %v503_v0  ;;  %434 = vmatprep.subr.mxu0 %v503_v0 }
  0x3a   :  { %406 = vmatpush3.msra.mxu1 %v120_v19  ;;  %435 = vmatpush3.msra.mxu0 %v215_v32 }
  0x3b   :  { %436 = vmatprep.subr.mxu0 %v503_v0 }
  0x3c   :  { %437 = vmatpush3.msra.mxu0 %v214_v38 }
  0x3d   :  { %438 = vmatprep.subr.mxu0 %v503_v0 }
  0x3e   :  { %439 = vmatpush3.msra.mxu0 %v213_v39 }
  0x3f   :  { %440 = vmatprep.subr.mxu0 %v503_v0 }
  0x40   :  { %441 = vmatpush3.msra.mxu0 %v212_v40 }
  0xdf   :  { %v115_v34 = vpop.f32.mrf.mxu0 }
  0xe0   :  { %v116_v35 = vadd.f32 %v327_v33, %v115_v34 }
  0xe1   :  { %v374_v36 = vpop.f32.mrf.mxu0 }
  0xe2   :  { %v119_v37 = vmax.f32 %v116_v35, 0.0 }
  0xe4   :  { %408 = vmatmul.mubr.f32.vlgmr.msra.gmra.mxu1 %v119_v37 }
 0x1a4   :  { %v207_v42 = vpop.f32.mrf.mxu1 }
 0x1a5   :  { %v208_v43 = vadd.f32 %v329_v41, %v207_v42 }
 0x1a6   :  { %v409_v44 = vpop.f32.mrf.mxu1 }
 0x1a7   :  { %v211_v45 = vmax.f32 %v208_v43, 0.0 }
 0x1a9   :  { %443 = vmatmul.mubr.f32.vlgmr.msra.gmra.mxu0 %v211_v45 }
 0x269   :  { %v299_v49 = vpop.f32.mrf.mxu0 }
 0x26a   :  { %v300_v50 = vadd.f32 %v330_v48, %v299_v49 }
 0x26b   :  { %v444_v51 = vpop.f32.mrf.mxu0 }
 0x26c   :  { %v306_v52 = vsel %vm305_vm2, %v300_v50, -1e+30 }
 0x26d   :  { %307 = vmax.xlane.f32.xlu0 %v306_v52 }
 0x2f6   :  { %v308_v53 = vpop.xlane.xlu0 %307 }
 0x2f7   :  { %v309_v54 = vsub.f32 %v306_v52, %v308_v53 }
 0x2f9   :  { %v310_v55 = vmul.f32 1.442695, %v309_v54 }
 0x2fb   :  { %451 = vpow2.f32 %v310_v55 }
 0x308   :  { %v452_v56 = vpop.eup %451 }
 0x309   :  { %312 = vadd.xlane.f32.xlu0 %v452_v56 }
 0x392   :  { %v313_v57 = vpop.xlane.xlu0 %312 }
 0x393   :  { %453 = vrcp.f32 %v313_v57 }
 0x3a0   :  { %v454_v58 = vpop.eup %453 }
 0x3a1   :  { %v315_v59 = vmul.f32 %v454_v58, %v313_v57 }
 0x3a3   :  { %v316_v60 = vsub.f32 2.0, %v315_v59 }
 0x3a5   :  { %v317_v61 = vmul.f32 %v454_v58, %v316_v60 }
 0x3a7   :  { %v318_v62 = vmul.f32 %v452_v56, %v317_v61 }
 0x3a9   :  { %v319_v63 = vsel %vm305_vm2, %v318_v62, %v300_v50 }
 0x3aa   :  { %320 = vst [vmem:[%s573_s2] sm:$0xff] %v319_v63 }
 0x3ab   :  { %325 = vsyncpa [#allocation3], 1 }
 0x3ac   :  { %326 = vsyncpa [#allocation5], 1 }

</bundles_post_ra>
